<compile_context>
chip_gen: v7x
topology: tpu7x:2x2x1
jax: 0.10.0
libtpu: 0.0.40
codegen_flags: <defaults>
</compile_context>

<pallas_src>
import functools

import jax
import jax.numpy as jnp
from jax.experimental import pallas as pl
from jax.experimental.pallas import tpu as pltpu


def _mlp_kernel(obs_ref, act_ref, w1o_ref, w1a_ref, b1_ref, w2_ref, b2_ref,
                w3_ref, b3_ref, o_ref, *, bf16_epilogue):
    # Layer 1 (fused concat): x @ W1 == obs @ W1[:obs_dim] + act @ W1[obs_dim:]
    obs = obs_ref[...].astype(jnp.bfloat16)
    act = act_ref[...].astype(jnp.bfloat16)
    h1 = jnp.dot(obs, w1o_ref[...], preferred_element_type=jnp.float32)
    h1 = h1 + jnp.dot(act, w1a_ref[...], preferred_element_type=jnp.float32)

    if bf16_epilogue:
        # v6e/v7x: packed-bf16 VALU -> half the epilogue slots / VMEM traffic
        # on the dominant (tile_b, 128) stream.  b1_ref is bf16 here.
        h1 = jnp.maximum(h1.astype(jnp.bfloat16) + b1_ref[...], 0.0)
    else:
        # v5e: no bf16 VALU; keep the epilogue in f32, cast only for the MXU.
        h1 = jnp.maximum(h1 + b1_ref[...], 0.0).astype(jnp.bfloat16)

    # Layer 2 (128 -> 32), bf16 MXU matmul, f32 accumulate. (tile_b, 32) is
    # tiny, so its epilogue stays in f32 for final-layer accuracy.
    h2 = jnp.dot(h1, w2_ref[...], preferred_element_type=jnp.float32)
    h2 = jnp.maximum(h2 + b2_ref[...], 0.0)

    # Layer 3 (32 -> 1): VPU multiply + lane reduce; b3 is an SMEM scalar.
    r = jnp.sum(h2 * w3_ref[...], axis=1, keepdims=True) + b3_ref[0, 0]
    o_ref[...] = r.astype(o_ref.dtype)                      # (tile_b, 1)


def _round_up(x, m):
    return ((x + m - 1) // m) * m


def _default_bf16_epilogue():
    # bf16 VALU exists on v6e/v7x but not v5e/v5p -> keep f32 epilogue there.
    try:
        kind = jax.devices()[0].device_kind.lower()
    except Exception:
        return True
    return "v5" not in kind


def intrinsic_reward_forward(obs, act, params, *, tile_b=4096,
                             bf16_epilogue=None):
    """Pallas implementation of IntrinsicRewardModel.forward(obs, act)."""
    if bf16_epilogue is None:
        bf16_epilogue = _default_bf16_epilogue()

    w1_obs, w1_act, b1, w2, b2, w3, b3 = params
    # Accept obs/act in their native dtype (f32 or bf16); no wrapper cast --
    # a standalone cast would be an extra un-hidden HBM pass.

    B, obs_dim = obs.shape
    _, act_dim = act.shape
    D = obs_dim + act_dim

    # MXU operands in bf16; b2 / w3 / b3 stay f32.  b1 matches the epilogue.
    w1_obs = w1_obs.astype(jnp.bfloat16)          # (obs_dim, 128)
    w1_act = w1_act.astype(jnp.bfloat16)          # (act_dim, 128)
    w2 = w2.astype(jnp.bfloat16)                  # (128, 32)
    b1_dtype = jnp.bfloat16 if bf16_epilogue else jnp.float32
    b1 = b1.reshape(1, 128).astype(b1_dtype)
    b2 = b2.reshape(1, 32).astype(jnp.float32)
    w3 = w3.reshape(1, 32).astype(jnp.float32)    # final layer as a row
    b3 = b3.reshape(1, 1).astype(jnp.float32)     # SMEM scalar

    # Batch tiling: big tiles so per-grid-step (~0.35 us) overhead is
    # amortized, but at least 2 grid steps when B > tile_b so the "parallel"
    # axis can shard across v7x's 2 TensorCores.  VMEM stays trivial
    # (<~8 MiB at tile_b=4096 incl. double buffers + the (tile_b,128) h1).
    if B <= tile_b:
        tile_b = B      # single tile; block == full dim is always legal
    else:
        tile_b = min(tile_b, _round_up(pl.cdiv(B, 2), 8))
        assert tile_b % 8 == 0, "tile_b must be a multiple of 8"
    grid_b = pl.cdiv(B, tile_b)

    resident = lambda shape: pl.BlockSpec(shape, lambda i: (0, 0))

    in_bytes = obs.dtype.itemsize
    flops = 2 * B * (D * 128 + 128 * 32 + 32)
    bytes_accessed = (B * D * in_bytes + B * 4       # obs/act read + out write
                      + (D * 128 + 128 * 32) * 2     # bf16 weights
                      + (128 + 32 + 32 + 1) * 4)     # biases + w3

    kernel = functools.partial(_mlp_kernel, bf16_epilogue=bf16_epilogue)

    return pl.pallas_call(
        kernel,
        out_shape=jax.ShapeDtypeStruct((B, 1), jnp.float32),
        grid_spec=pltpu.PrefetchScalarGridSpec(
            num_scalar_prefetch=0,
            grid=(grid_b,),
            in_specs=[
                pl.BlockSpec((tile_b, obs_dim), lambda i: (i, 0)),   # obs tile
                pl.BlockSpec((tile_b, act_dim), lambda i: (i, 0)),   # act tile
                resident((obs_dim, 128)),                            # W1_obs
                resident((act_dim, 128)),                            # W1_act
                resident((1, 128)),                                  # b1
                resident((128, 32)),                                 # W2
                resident((1, 32)),                                   # b2
                resident((1, 32)),                                   # w3 row
                pl.BlockSpec(memory_space=pltpu.MemorySpace.SMEM),   # b3 scalar
            ],
            out_specs=pl.BlockSpec((tile_b, 1), lambda i: (i, 0)),
        ),
        compiler_params=pltpu.CompilerParams(
            dimension_semantics=("parallel",)),
        cost_estimate=pl.CostEstimate(
            flops=flops, transcendentals=0, bytes_accessed=bytes_accessed),
    )(obs, act, w1_obs, w1_act, b1, w2, b2, w3, b3)


def init_params(key, obs_dim, act_dim):
    """Synthetic init matching nn.Linear's default (uniform +/- 1/sqrt(fan_in)).

    torch Linear(i, o).weight has shape (o, i); we store the transpose (i, o)
    and split W1 along its input axis into obs / act halves so the kernel can
    fuse the concat. The final layer weight is stored as a (1, 32) row."""
    d_in = obs_dim + act_dim
    ks = jax.random.split(key, 6)

    def lin(kw, kb, fan_in, fan_out):
        bound = 1.0 / jnp.sqrt(float(fan_in))
        w = jax.random.uniform(kw, (fan_in, fan_out), jnp.float32, -bound, bound)
        b = jax.random.uniform(kb, (1, fan_out), jnp.float32, -bound, bound)
        return w, b

    w1, b1 = lin(ks[0], ks[1], d_in, 128)
    w2, b2 = lin(ks[2], ks[3], 128, 32)
    w3, b3 = lin(ks[4], ks[5], 32, 1)
    return (w1[:obs_dim], w1[obs_dim:], b1, w2, b2, w3.T, b3)


def _reference(obs, act, params, bf16_epilogue):
    """Pure-JAX reference mirroring the kernel's exact numerics."""
    w1o, w1a, b1, w2, b2, w3, b3 = params
    h1 = jnp.dot(obs.astype(jnp.bfloat16), w1o.astype(jnp.bfloat16),
                 preferred_element_type=jnp.float32)
    h1 = h1 + jnp.dot(act.astype(jnp.bfloat16), w1a.astype(jnp.bfloat16),
                      preferred_element_type=jnp.float32)
    if bf16_epilogue:
        h1 = jnp.maximum(h1.astype(jnp.bfloat16)
                         + b1.reshape(1, 128).astype(jnp.bfloat16), 0.0)
    else:
        h1 = jnp.maximum(h1 + b1.reshape(1, 128), 0.0).astype(jnp.bfloat16)
    h2 = jnp.dot(h1, w2.astype(jnp.bfloat16), preferred_element_type=jnp.float32)
    h2 = jnp.maximum(h2 + b2.reshape(1, 32), 0.0)
    return jnp.sum(h2 * w3.reshape(1, 32), axis=1, keepdims=True) + b3.reshape(1, 1)


if __name__ == "__main__":
    key = jax.random.PRNGKey(0)
    k_obs, k_act, k_params = jax.random.split(key, 3)

    batch, obs_dim, act_dim = 8, 16, 8
    obs = jax.random.normal(k_obs, (batch, obs_dim), jnp.float32)
    act = jax.random.normal(k_act, (batch, act_dim), jnp.float32)
    params = init_params(k_params, obs_dim, act_dim)

    bf16_ep = _default_bf16_epilogue()
    out = intrinsic_reward_forward(obs, act, params, bf16_epilogue=bf16_ep)
    jax.block_until_ready(out)
    assert out.shape == (batch, 1)

    # Tight check against a reference that mirrors the kernel math exactly.
    ref = _reference(obs, act, params, bf16_ep)
    assert jnp.allclose(out, ref, atol=1e-3, rtol=1e-3)

    # Loose sanity check against the original full-f32 module math
    # (bf16 MXU operands introduce ~1e-2 relative deviation).
    w1o, w1a, b1, w2, b2, w3, b3 = params
    x = jnp.concatenate([obs, act], axis=1)
    w1 = jnp.concatenate([w1o, w1a], axis=0)
    ref32 = jnp.maximum(x @ w1 + b1, 0.0)
    ref32 = jnp.maximum(ref32 @ w2 + b2, 0.0)
    ref32 = ref32 @ w3.reshape(32, 1) + b3.reshape(1, 1)
    assert jnp.allclose(out, ref32, atol=1e-1, rtol=1e-1)

    # Also exercise the multi-tile / masked-last-tile path on a larger batch.
    big_b = 9000  # > tile_b cap path, non-multiple of 8 tail handled by mask
    obs_big = jax.random.normal(k_obs, (big_b, obs_dim), jnp.float32)
    act_big = jax.random.normal(k_act, (big_b, act_dim), jnp.float32)
    out_big = intrinsic_reward_forward(obs_big, act_big, params,
                                       bf16_epilogue=bf16_ep)
    jax.block_until_ready(out_big)
    ref_big = _reference(obs_big, act_big, params, bf16_ep)
    assert out_big.shape == (big_b, 1)
    assert jnp.allclose(out_big, ref_big, atol=1e-3, rtol=1e-3)

    print("KERNEL_OK")
</pallas_src>

<mosaic_0001>
module attributes {stable_mosaic.version = 11 : i64} {
  func.func @_mlp_kernel(%arg0: i32, %arg1: memref<8x16xf32, #tpu.memory_space<vmem>>, %arg2: memref<8x8xf32, #tpu.memory_space<vmem>>, %arg3: memref<16x128xbf16, #tpu.memory_space<vmem>>, %arg4: memref<8x128xbf16, #tpu.memory_space<vmem>>, %arg5: memref<1x128xbf16, #tpu.memory_space<vmem>>, %arg6: memref<128x32xbf16, #tpu.memory_space<vmem>>, %arg7: memref<1x32xf32, #tpu.memory_space<vmem>>, %arg8: memref<1x32xf32, #tpu.memory_space<vmem>>, %arg9: memref<1x1xf32, #tpu.memory_space<smem>>, %arg10: memref<8x1xf32, #tpu.memory_space<vmem>>) attributes {dimension_semantics = [#tpu.dimension_semantics<parallel>], iteration_bounds = array<i64: 1>, scalar_prefetch = 0 : i64, scratch_operands = 0 : i64, tpu.core_type = #tpu.core_type<tc>, window_params = [{transform_indices = @transform_0, window_bounds = array<i64: 8, 16>}, {transform_indices = @transform_1, window_bounds = array<i64: 8, 8>}, {pipeline_mode = #tpu.pipeline_mode<synchronous>, transform_indices = @transform_2, window_bounds = array<i64: 16, 128>}, {pipeline_mode = #tpu.pipeline_mode<synchronous>, transform_indices = @transform_3, window_bounds = array<i64: 8, 128>}, {pipeline_mode = #tpu.pipeline_mode<synchronous>, transform_indices = @transform_4, window_bounds = array<i64: 1, 128>}, {pipeline_mode = #tpu.pipeline_mode<synchronous>, transform_indices = @transform_5, window_bounds = array<i64: 128, 32>}, {pipeline_mode = #tpu.pipeline_mode<synchronous>, transform_indices = @transform_6, window_bounds = array<i64: 1, 32>}, {pipeline_mode = #tpu.pipeline_mode<synchronous>, transform_indices = @transform_7, window_bounds = array<i64: 1, 32>}, {transform_indices = @transform_8, window_bounds = array<i64: 1, 1>}, {transform_indices = @transform_9, window_bounds = array<i64: 8, 1>}]} {
    %c0 = arith.constant 0 : index
    %c0_0 = arith.constant 0 : index
    %0 = vector.load %arg1[%c0, %c0_0] : memref<8x16xf32, #tpu.memory_space<vmem>>, vector<8x16xf32>
    %1 = arith.truncf %0 : vector<8x16xf32> to vector<8x16xbf16>
    %c0_1 = arith.constant 0 : index
    %c0_2 = arith.constant 0 : index
    %2 = vector.load %arg2[%c0_1, %c0_2] : memref<8x8xf32, #tpu.memory_space<vmem>>, vector<8x8xf32>
    %3 = arith.truncf %2 : vector<8x8xf32> to vector<8x8xbf16>
    %c0_3 = arith.constant 0 : index
    %c0_4 = arith.constant 0 : index
    %4 = vector.load %arg3[%c0_3, %c0_4] : memref<16x128xbf16, #tpu.memory_space<vmem>>, vector<16x128xbf16>
    %cst = arith.constant dense<0.000000e+00> : vector<8x128xf32>
    %5 = tpu.matmul %1, %4, %cst {dimension_numbers = #tpu.dot_dimension_numbers<[1], [0], [0], [1], [0, 0, 1, 1], [], []>} : vector<8x16xbf16>, vector<16x128xbf16>, vector<8x128xf32> -> vector<8x128xf32>
    %c0_5 = arith.constant 0 : index
    %c0_6 = arith.constant 0 : index
    %6 = vector.load %arg4[%c0_5, %c0_6] : memref<8x128xbf16, #tpu.memory_space<vmem>>, vector<8x128xbf16>
    %cst_7 = arith.constant dense<0.000000e+00> : vector<8x128xf32>
    %7 = tpu.matmul %3, %6, %cst_7 {dimension_numbers = #tpu.dot_dimension_numbers<[1], [0], [0], [1], [0, 0, 1, 1], [], []>} : vector<8x8xbf16>, vector<8x128xbf16>, vector<8x128xf32> -> vector<8x128xf32>
    %8 = arith.addf %5, %7 : vector<8x128xf32>
    %9 = arith.truncf %8 : vector<8x128xf32> to vector<8x128xbf16>
    %c0_8 = arith.constant 0 : index
    %c0_9 = arith.constant 0 : index
    %10 = vector.load %arg5[%c0_8, %c0_9] : memref<1x128xbf16, #tpu.memory_space<vmem>>, vector<1x128xbf16>
    %11 = vector.broadcast %10 : vector<1x128xbf16> to vector<8x128xbf16>
    %12 = arith.addf %9, %11 : vector<8x128xbf16>
    %cst_10 = arith.constant 0.000000e+00 : bf16
    %13 = vector.broadcast %cst_10 : bf16 to vector<8x128xbf16>
    %14 = arith.maximumf %12, %13 : vector<8x128xbf16>
    %c0_11 = arith.constant 0 : index
    %c0_12 = arith.constant 0 : index
    %15 = vector.load %arg6[%c0_11, %c0_12] : memref<128x32xbf16, #tpu.memory_space<vmem>>, vector<128x32xbf16>
    %cst_13 = arith.constant dense<0.000000e+00> : vector<8x32xf32>
    %16 = tpu.matmul %14, %15, %cst_13 {dimension_numbers = #tpu.dot_dimension_numbers<[1], [0], [0], [1], [0, 0, 1, 1], [], []>} : vector<8x128xbf16>, vector<128x32xbf16>, vector<8x32xf32> -> vector<8x32xf32>
    %c0_14 = arith.constant 0 : index
    %c0_15 = arith.constant 0 : index
    %17 = vector.load %arg7[%c0_14, %c0_15] : memref<1x32xf32, #tpu.memory_space<vmem>>, vector<1x32xf32>
    %18 = vector.broadcast %17 : vector<1x32xf32> to vector<8x32xf32>
    %19 = arith.addf %16, %18 : vector<8x32xf32>
    %cst_16 = arith.constant 0.000000e+00 : f32
    %20 = vector.broadcast %cst_16 : f32 to vector<8x32xf32>
    %21 = arith.maximumf %19, %20 : vector<8x32xf32>
    %c0_17 = arith.constant 0 : index
    %c0_18 = arith.constant 0 : index
    %22 = vector.load %arg8[%c0_17, %c0_18] : memref<1x32xf32, #tpu.memory_space<vmem>>, vector<1x32xf32>
    %23 = vector.broadcast %22 : vector<1x32xf32> to vector<8x32xf32>
    %24 = arith.mulf %21, %23 : vector<8x32xf32>
    %cst_19 = arith.constant dense<0.000000e+00> : vector<8xf32>
    %25 = vector.multi_reduction <add>, %24, %cst_19 [1] : vector<8x32xf32> to vector<8xf32>
    %26 = vector.shape_cast %25 : vector<8xf32> to vector<8x1xf32>
    %c0_20 = arith.constant 0 : index
    %c0_21 = arith.constant 0 : index
    %27 = memref.load %arg9[%c0_20, %c0_21] : memref<1x1xf32, #tpu.memory_space<smem>>
    %28 = vector.broadcast %27 : f32 to vector<8x1xf32>
    %29 = arith.addf %26, %28 : vector<8x1xf32>
    %c0_22 = arith.constant 0 : index
    %c0_23 = arith.constant 0 : index
    %30 = vector.load %arg10[%c0_22, %c0_23] : memref<8x1xf32, #tpu.memory_space<vmem>>, vector<8x1xf32>
    tpu.vector_store %arg10[%c0_22, %c0_23], %29 {strides = array<i32>} : memref<8x1xf32, #tpu.memory_space<vmem>>, vector<8x1xf32>,
    return
  }
  func.func @transform_0(%arg0: i32) -> (i32, i32) {
    %c0_i32 = arith.constant 0 : i32
    %c0_i32_0 = arith.constant 0 : i32
    return %arg0, %c0_i32 : i32, i32
  }
  func.func @transform_1(%arg0: i32) -> (i32, i32) {
    %c0_i32 = arith.constant 0 : i32
    %c0_i32_0 = arith.constant 0 : i32
    return %arg0, %c0_i32 : i32, i32
  }
  func.func @transform_2(%arg0: i32) -> (i32, i32) {
    %c0_i32 = arith.constant 0 : i32
    %c0_i32_0 = arith.constant 0 : i32
    %c0_i32_1 = arith.constant 0 : i32
    return %c0_i32, %c0_i32_0 : i32, i32
  }
  func.func @transform_3(%arg0: i32) -> (i32, i32) {
    %c0_i32 = arith.constant 0 : i32
    %c0_i32_0 = arith.constant 0 : i32
    %c0_i32_1 = arith.constant 0 : i32
    return %c0_i32, %c0_i32_0 : i32, i32
  }
  func.func @transform_4(%arg0: i32) -> (i32, i32) {
    %c0_i32 = arith.constant 0 : i32
    %c0_i32_0 = arith.constant 0 : i32
    %c0_i32_1 = arith.constant 0 : i32
    return %c0_i32, %c0_i32_0 : i32, i32
  }
  func.func @transform_5(%arg0: i32) -> (i32, i32) {
    %c0_i32 = arith.constant 0 : i32
    %c0_i32_0 = arith.constant 0 : i32
    %c0_i32_1 = arith.constant 0 : i32
    return %c0_i32, %c0_i32_0 : i32, i32
  }
  func.func @transform_6(%arg0: i32) -> (i32, i32) {
    %c0_i32 = arith.constant 0 : i32
    %c0_i32_0 = arith.constant 0 : i32
    %c0_i32_1 = arith.constant 0 : i32
    return %c0_i32, %c0_i32_0 : i32, i32
  }
  func.func @transform_7(%arg0: i32) -> (i32, i32) {
    %c0_i32 = arith.constant 0 : i32
    %c0_i32_0 = arith.constant 0 : i32
    %c0_i32_1 = arith.constant 0 : i32
    return %c0_i32, %c0_i32_0 : i32, i32
  }
  func.func @transform_8(%arg0: i32) -> (i32, i32) {
    %c0_i32 = arith.constant 0 : i32
    %c0_i32_0 = arith.constant 0 : i32
    %c0_i32_1 = arith.constant 0 : i32
    return %c0_i32, %c0_i32_0 : i32, i32
  }
  func.func @transform_9(%arg0: i32) -> (i32, i32) {
    %c0_i32 = arith.constant 0 : i32
    %c0_i32_0 = arith.constant 0 : i32
    return %arg0, %c0_i32 : i32, i32
  }
}

</mosaic_0001>

<bundles_post_ra>
// kernel: tpu_custom_call.1
= control target key start
LH: loop header
LB: loop body
LE: loop exit
PB: predicated region body
PF: predicated region fallthrough
CT: control target
= control target key end

     0   :  { %vm45_vm0 = vcmask 1043456   ;;  %v357_v0 = vmov 0.0   ;;  %vm358_vm1 = vmmov 0   ;;  %vm41_vm2 = vcmask 64512   ;;  %s464_s3 = inlined_call_operand.vmem [shape: bf16[8,128], index: 3, kind: input, shape index: {}]   ;;  %s465_s1 = inlined_call_operand.vmem [shape: f32[8,8], index: 1, kind: input, shape index: {}]   ;;  %s466_s2 = inlined_call_operand.vmem [shape: bf16[16,128], index: 2, kind: input, shape index: {}]   ;;  %s467_s5 = inlined_call_operand.vmem [shape: bf16[128,32], index: 5, kind: input, shape index: {}]   ;;  %s468_s0 = inlined_call_operand.vmem [shape: f32[8,16], index: 0, kind: input, shape index: {}]   ;;  %s469_s4 = inlined_call_operand.vmem [shape: bf16[1,128], index: 4, kind: input, shape index: {}]   ;;  %s470_s6 = inlined_call_operand.vmem [shape: f32[1,32], index: 6, kind: input, shape index: {}]   ;;  %s471_s7 = inlined_call_operand.vmem [shape: f32[1,32], index: 7, kind: input, shape index: {}]   ;;  %s472_s8 = inlined_call_operand.<no memory space> [shape: f32[1,1], index: 8, kind: input, shape index: {}]   ;;  %s473_s9 = inlined_call_operand.vmem [shape: f32[8,1], index: 9, kind: output, shape index: {}]  }
   0x1   :  { %309 = vmatprep.subr.bf16.mxu0 %v357_v0  ;;  %v40_v1 = vld [vmem:[%s464_s3] sm:$0xf]  ;;  %311 = vmatprep.mubr.msk.bf16.mxu0 %vm358_vm1, %v357_v0  ;;  %v350_v7 = vld [vmem:[%s467_s5 + $0x8] sm:$0xff]   ;;  %v351_v8 = vld [vmem:[%s467_s5 + $0x10] sm:$0xff]   ;;  %vm95_vm3 = vcmask 130048   ;;  %v144_v16 = vlaneseq  ;;  %v359_v28 = vmov 0   ;;  %v275_v40 = vstv %s472_s8 }
   0x2   :  { %v36_v2 = vld [vmem:[%s465_s1] sm:$0xff]  ;;  %v47_v3 = vsel %vm45_vm0, %v40_v1, 0  ;;  %321 = vmatprep.subr.bf16.mxu1 %v357_v0  ;;  %337 = vmatprep.mubr.msk.bf16.mxu1 %vm358_vm1, %v357_v0  ;;  %v352_v10 = vld [vmem:[%s467_s5 + $0x18] sm:$0xff]   ;;  %v354_v13 = vld [vmem:[%s467_s5 + $0x28] sm:$0xff]   ;;  %vm270_vm4 = vcmask 261120   ;;  %vm277_vm5 = vcmask 7168  }
   0x3   :  { %v37_v4 = vpack.c.bf16 %v36_v2, %v36_v2  ;;  %v348_v5 = vld [vmem:[%s466_s2] sm:$0xff]   ;;  %310 = vmatpush3.bf16.msra.mxu0 %v47_v3  ;;  %v355_v14 = vld [vmem:[%s467_s5 + $0x30] sm:$0xff]   ;;  %v356_v15 = vld [vmem:[%s467_s5 + $0x38] sm:$0xff]   ;;  %v145_v17 = vshrl.u32 %v144_v16, 7 }
   0x4   :  { %v349_v6 = vld [vmem:[%s467_s5] sm:$0xff]   ;;  %315 = vmatprep.subr.bf16.mxu0 %v357_v0 }
   0x5   :  { %322 = vmatpush3.bf16.msra.mxu1 %v349_v6  ;;  %v34_v9 = vld [vmem:[%s468_s0] sm:$0xff]  ;;  %v146_v20 = vsub.s32 0, %v145_v17 }
   0x6   :  { %312 = vmatmul.mubr.msk.bf16.vlgmr.msra.gmra.mrb[0].mxu0 %vm41_vm2, %v37_v4  ;;  %323 = vmatprep.subr.bf16.mxu1 %v357_v0  ;;  %v35_v11 = vpack.c.bf16 %v34_v9, %v34_v9  ;;  %v353_v12 = vld [vmem:[%s467_s5 + $0x20] sm:$0xff]  }
   0x7   :  { %316 = vmatpush3.bf16.msra.mxu0 %v348_v5  ;;  %317 = vmatprep.mubr.msk.bf16.mxu0 %vm358_vm1, %v357_v0  ;;  %v140_v18 = vld [vmem:[%s469_s4] sm:$0x1] }
   0x8   :  { %v142_v19 = vpack.i.b16 %v140_v18, %v140_v18  ;;  %v286_v30 = vld [vmem:[%s470_s6] ss:$0 sm:$0xff] }
   0x9   :  { %324 = vmatpush3.bf16.msra.mxu1 %v350_v7  ;;  %v295_v35 = vld [vmem:[%s471_s7] ss:$0 sm:$0xff] }
   0xa   :  { %325 = vmatprep.subr.bf16.mxu1 %v357_v0  ;;  %v147_v21 = vrot.slane %v142_v19, %v146_v20 }
   0xd   :  { %326 = vmatpush3.bf16.msra.mxu1 %v351_v8 }
   0xe   :  { %327 = vmatprep.subr.bf16.mxu1 %v357_v0 }
  0x11   :  { %328 = vmatpush3.bf16.msra.mxu1 %v352_v10 }
  0x12   :  { %318 = vmatmul.mubr.msk.bf16.vlgmr.msra.gmra.mrb[0].mxu0 %vm95_vm3, %v35_v11  ;;  %329 = vmatprep.subr.bf16.mxu1 %v357_v0 }
  0x15   :  { %330 = vmatpush3.bf16.msra.mxu1 %v353_v12 }
  0x16   :  { %331 = vmatprep.subr.bf16.mxu1 %v357_v0 }
  0x19   :  { %332 = vmatpush3.bf16.msra.mxu1 %v354_v13 }
  0x1a   :  { %333 = vmatprep.subr.bf16.mxu1 %v357_v0 }
  0x1d   :  { %334 = vmatpush3.bf16.msra.mxu1 %v355_v14 }
  0x1e   :  { %335 = vmatprep.subr.bf16.mxu1 %v357_v0 }
  0x21   :  { %336 = vmatpush3.bf16.msra.mxu1 %v356_v15 }
  0xe5   :  { %v133_v22 = vpop.f32.mrb[0].mxu0 }
  0xe6   :  { %v139_v23 = vpack.c.bf16 %v133_v22, %v133_v22  ;;  %v319_v24 = vpop.f32.mrb[1].mxu0 }
  0xe7   :  { %v136_v25 = vpop.f32.mrb[2].mxu0 }
  0xe8   :  { %v148_v26 = vadd.bf16 %v147_v21, %v139_v23  ;;  %v320_v27 = vpop.f32.mrb[3].mxu0 }
  0xea   :  { %v149_v29 = vmax.bf16 %v359_v28, %v148_v26 }
  0xec   :  { %338 = vmatmul.mubr.bf16.vlgmr.msra.gmra.mrb[0].mxu1 %v149_v29 }
 0x1bf   :  { %v255_v31 = vpop.f32.mrb[0].mxu1 }
 0x1c0   :  { %v256_v32 = vadd.f32 %v286_v30, %v255_v31  ;;  %v339_v33 = vpop.f32.mrb[1].mxu1 }
 0x1c1   :  { %v258_v34 = vpop.f32.mrb[2].mxu1 }
 0x1c2   :  { %v261_v36 = vmax.f32 %v256_v32, 0.0  ;;  %v340_v37 = vpop.f32.mrb[3].mxu1 }
 0x1c4   :  { %v269_v38 = vmul.f32 %v295_v35, %v261_v36 }
 0x1c6   :  { %v271_v39 = vsel %vm270_vm4, %v269_v38, 0.0 }
 0x1c7   :  { %272 = vadd.xlane.f32.xlu0 %v271_v39 }
 0x254   :  { %v273_v41 = vpop.xlane.xlu0 %272 }
 0x255   :  { %v276_v42 = vadd.f32 %v275_v40, %v273_v41 }
 0x257   :  { %278 = vst.msk [vmem:[%s473_s9] sm:$0xff] %vm277_vm5, %v276_v42 }

</bundles_post_ra>
